<compile_context>
chip_gen: v7x
topology: tpu7x:2x2x1
jax: 0.10.0
libtpu: 0.0.40
codegen_flags: <defaults>
</compile_context>

<pallas_src>
import jax
import jax.numpy as jnp
from jax.experimental import pallas as pl
from jax.experimental.pallas import tpu as pltpu


def _normalize_kernel(mean_ref, inv_std_ref, img_ref, out_ref):
    # mean_ref / inv_std_ref: (ROW_BLK, 1) VMEM column vectors (per (n,c) row).
    # img_ref / out_ref:      (ROW_BLK, LANE_BLK) VMEM tiles, lane-dense last dim.
    out_ref[...] = (img_ref[...] - mean_ref[...]) * inv_std_ref[...]


def normalization_forward(img, mean, std, *, target_tile_bytes=2 * 1024 * 1024):
    """Pallas equivalent of Normalization.forward.

    img: (N, C, H, W); mean, std: (C,)
    """
    N, C, H, W = img.shape
    R = N * C
    HW = H * W
    dtype = img.dtype
    itemsize = jnp.dtype(dtype).itemsize

    # Free, contiguous reshape to a lane-dense 2-D view: rows = (n, c) pairs.
    img2 = img.reshape(R, HW)

    # Per-row (= per-channel) mean and 1/std column vectors (tiny: R elements).
    mean_rows = jnp.tile(mean.astype(dtype), N).reshape(R, 1)
    inv_std_rows = jnp.tile((1.0 / std).astype(dtype), N).reshape(R, 1)

    # --- Tile sizing --------------------------------------------------------
    # Rows: multiple of 8 (sublane) or the full row extent.
    if R % 8 == 0:
        row_blk = min(R, 512)
    else:
        row_blk = R

    # Lanes: multiple of 128 (full-vreg, unmasked stores), sized so each tile
    # moves ~target_tile_bytes; partial edge blocks are masked by Pallas.
    if HW < 128:
        lane_blk = HW  # full-dim block (allowed even if not a multiple of 128)
    else:
        lane_target = max(128, target_tile_bytes // (row_blk * itemsize))
        lane_blk = (lane_target // 128) * 128
        lane_blk = min(lane_blk, (HW // 128) * 128)

    grid = (pl.cdiv(R, row_blk), pl.cdiv(HW, lane_blk))

    tile_bytes = row_blk * lane_blk * itemsize
    # Budget: 2 buffers each for the input and output tile, plus headroom.
    vmem_limit = int(min(max(4 * tile_bytes + (1 << 20), 8 << 20), 48 << 20))

    out2 = pl.pallas_call(
        _normalize_kernel,
        out_shape=jax.ShapeDtypeStruct((R, HW), dtype),
        grid_spec=pltpu.PrefetchScalarGridSpec(
            num_scalar_prefetch=0,
            grid=grid,
            in_specs=[
                pl.BlockSpec((row_blk, 1), lambda i, j: (i, 0)),          # mean rows
                pl.BlockSpec((row_blk, 1), lambda i, j: (i, 0)),          # 1/std rows
                pl.BlockSpec((row_blk, lane_blk), lambda i, j: (i, j)),   # img tile
            ],
            out_specs=pl.BlockSpec((row_blk, lane_blk), lambda i, j: (i, j)),
        ),
        compiler_params=pltpu.CompilerParams(
            dimension_semantics=("parallel", "parallel"),
            vmem_limit_bytes=vmem_limit,
        ),
    )(mean_rows, inv_std_rows, img2)

    return out2.reshape(N, C, H, W)


if __name__ == "__main__":
    # Canonical ImageNet / style-transfer normalization constants (C = 3).
    mean = jnp.array([0.485, 0.456, 0.406], dtype=jnp.float32)
    std = jnp.array([0.229, 0.224, 0.225], dtype=jnp.float32)

    key = jax.random.PRNGKey(0)
    img = jax.random.uniform(key, (2, 3, 16, 16), dtype=jnp.float32)

    out = normalization_forward(img, mean, std)
    out = jax.block_until_ready(out)

    # Plain-JAX reference (same broadcast semantics as the PyTorch module).
    ref = (img - mean[None, :, None, None]) / std[None, :, None, None]
    assert out.shape == ref.shape
    assert jnp.allclose(out, ref, atol=1e-5, rtol=1e-5), "mismatch vs reference"

    print("KERNEL_OK")
</pallas_src>

<mosaic_0001>
module attributes {stable_mosaic.version = 11 : i64} {
  func.func @_normalize_kernel(%arg0: i32, %arg1: i32, %arg2: memref<6x1xf32, #tpu.memory_space<vmem>>, %arg3: memref<6x1xf32, #tpu.memory_space<vmem>>, %arg4: memref<6x256xf32, #tpu.memory_space<vmem>>, %arg5: memref<6x256xf32, #tpu.memory_space<vmem>>) attributes {dimension_semantics = [#tpu.dimension_semantics<parallel>, #tpu.dimension_semantics<parallel>], iteration_bounds = array<i64: 1, 1>, scalar_prefetch = 0 : i64, scratch_operands = 0 : i64, tpu.core_type = #tpu.core_type<tc>, window_params = [{transform_indices = @transform_0, window_bounds = array<i64: 6, 1>}, {transform_indices = @transform_1, window_bounds = array<i64: 6, 1>}, {transform_indices = @transform_2, window_bounds = array<i64: 6, 256>}, {transform_indices = @transform_3, window_bounds = array<i64: 6, 256>}]} {
    %c0 = arith.constant 0 : index
    %c0_0 = arith.constant 0 : index
    %0 = vector.load %arg4[%c0, %c0_0] : memref<6x256xf32, #tpu.memory_space<vmem>>, vector<6x256xf32>
    %c0_1 = arith.constant 0 : index
    %c0_2 = arith.constant 0 : index
    %1 = vector.load %arg2[%c0_1, %c0_2] : memref<6x1xf32, #tpu.memory_space<vmem>>, vector<6x1xf32>
    %2 = vector.broadcast %1 : vector<6x1xf32> to vector<6x256xf32>
    %3 = arith.subf %0, %2 : vector<6x256xf32>
    %c0_3 = arith.constant 0 : index
    %c0_4 = arith.constant 0 : index
    %4 = vector.load %arg3[%c0_3, %c0_4] : memref<6x1xf32, #tpu.memory_space<vmem>>, vector<6x1xf32>
    %5 = vector.broadcast %4 : vector<6x1xf32> to vector<6x256xf32>
    %6 = arith.mulf %3, %5 : vector<6x256xf32>
    %c0_5 = arith.constant 0 : index
    %c0_6 = arith.constant 0 : index
    %7 = vector.load %arg5[%c0_5, %c0_6] : memref<6x256xf32, #tpu.memory_space<vmem>>, vector<6x256xf32>
    tpu.vector_store %arg5[%c0_5, %c0_6], %6 {strides = array<i32>} : memref<6x256xf32, #tpu.memory_space<vmem>>, vector<6x256xf32>,
    return
  }
  func.func @transform_0(%arg0: i32, %arg1: i32) -> (i32, i32) {
    %c0_i32 = arith.constant 0 : i32
    %c0_i32_0 = arith.constant 0 : i32
    return %arg0, %c0_i32 : i32, i32
  }
  func.func @transform_1(%arg0: i32, %arg1: i32) -> (i32, i32) {
    %c0_i32 = arith.constant 0 : i32
    %c0_i32_0 = arith.constant 0 : i32
    return %arg0, %c0_i32 : i32, i32
  }
  func.func @transform_2(%arg0: i32, %arg1: i32) -> (i32, i32) {
    %c0_i32 = arith.constant 0 : i32
    return %arg0, %arg1 : i32, i32
  }
  func.func @transform_3(%arg0: i32, %arg1: i32) -> (i32, i32) {
    %c0_i32 = arith.constant 0 : i32
    return %arg0, %arg1 : i32, i32
  }
}

</mosaic_0001>

<bundles_post_ra>
// kernel: tpu_custom_call.1
= control target key start
LH: loop header
LB: loop body
LE: loop exit
PB: predicated region body
PF: predicated region fallthrough
CT: control target
= control target key end

     0   :  { %v76_v1 = vmov 0   ;;  %s122_s0 = inlined_call_operand.vmem [shape: f32[6,1], index: 0, kind: input, shape index: {}]   ;;  %s123_s1 = inlined_call_operand.vmem [shape: f32[6,1], index: 1, kind: input, shape index: {}]   ;;  %s124_s2 = inlined_call_operand.vmem [shape: f32[6,256], index: 2, kind: input, shape index: {}]   ;;  %s125_s3 = inlined_call_operand.hbm [shape: f32[6,256], index: 3, kind: output, shape index: {}]  }
   0x1   :  { %v17_v0 = vld [vmem:[%s122_s0] sm:$0x3f]  ;;  %51 = vset.pattern.permute.xlu0 %v76_v1 }
   0x2   :  { %8 = vsyncpa [#allocation3], 0  ;;  %20 = vperm.xlu0 %51, %v17_v0   ;;  %v25_v2 = vld [vmem:[%s123_s1] sm:$0x3f]  ;;  %v16_v5 = vld [vmem:[%s124_s2 + $0x8] sm:$0x3f] }
   0x3   :  { %v15_v4 = vld [vmem:[%s124_s2] sm:$0x3f]  ;;  %s77_s20 = smov [#allocation2]  }
   0x4   :  { %s41_s0 = sshll.u32 %s77_s20, 4  ;;  %s42_s0 = int_to_ptr.vmem [resolvable:$true] %s41_s0 }
   0x5   :  { %s52_s1 = scalar_lea.vmem %s42_s0, 256  ;;  %p57_p1 = scmp.lt.s32.totalorder %s42_s0, %s42_s0 }
   0x6   :  { %28 = vperm.xlu0 %51, %v25_v2   ;;  %p53_p0 = scmp.ne.s32.totalorder %s42_s0, %s52_s1  ;;  %p58_p2 = scmp.lt.s32.totalorder %s52_s1, %s52_s1 }
   0x8   :  { %p59_p3 = por %p58_p2, %p57_p1 }
   0xa   :  { %p60_p4 = pnand %p59_p3, %p53_p0 }
  0x81   :  { %v21_v3 = vpop.permute.xlu0 %20 }
  0x82   :  { %v23_v6 = vsub.f32 %v15_v4, %v21_v3  ;;  %v24_v7 = vsub.f32 %v16_v5, %v21_v3 }
  0x85   :  { %v29_v8 = vpop.permute.xlu0 %28 }
  0x86   :  { %v31_v9 = vmul.f32 %v29_v8, %v23_v6  ;;  %v32_v10 = vmul.f32 %v29_v8, %v24_v7 }
  0x88   :  { %33 = vst [vmem:[#allocation2] sm:$0x3f] %v31_v9  ;;  %34 = vst [vmem:[#allocation2 + $0x8] sm:$0x3f] %v32_v10 }
  0x89   :  { %63 = shalt.err (!%p60_p4)
}
  0x8a   :  { %s64_s2 = scalar_lea.hbm %s125_s3, 256 }
  0x8b   :  { %p65_p5 = scmp.ne.s32.totalorder %s125_s3, %s64_s2  ;;  %p68_p6 = scmp.lt.u32.totalorder %s64_s2, %s125_s3 }
  0x8d   :  { %p70_p7 = pnand %p68_p6, %p65_p5 }
  0x8f   :  { %73 = shalt.err (!%p70_p7)
}
  0x90   :  { %44 = dma.vmem_to_hbm [thread:$0]  %s42_s0, 256, %s125_s3, [#allocation3]  }
  0x91   :  { %74 = dma.done.wait [#allocation3], 256  }
  0x92   :  { %75 = vsyncadd [#allocation3], 4294967040 }
  0x93   :  { %48 = vsyncpa [#allocation3], 1 }

</bundles_post_ra>
